<compile_context>
chip_gen: v6e
topology: v6e:2x2x1
jax: 0.10.0
libtpu: 0.0.40
codegen_flags: <defaults>
</compile_context>

<pallas_src>
import math

import numpy as np
import jax
import jax.numpy as jnp
from jax import lax
from jax.experimental import pallas as pl
from jax.experimental.pallas import tpu as pltpu


CHANNELS = (4, 8, 8)   # channel dims per layer (2 conv layers)
KERNEL = 3             # time kernel (odd -> output time length preserved)
BINS = 8               # mel bins; freq kernel == BINS, no freq padding
BN_EPS = 1e-5
BASE = 8               # sublane-aligned start row of the activation in the scratch


# ---------------------------------------------------------------------------
# Fused Pallas kernel body
# ---------------------------------------------------------------------------
def _make_kernel(T, F, KT, pad, layer_cfgs, matmul_dtype):
    """One grid step = one batch sample, all layers, all intermediates in VMEM.

    Activation layout: (T, F*C)  -- time on sublanes, (freq, chan) on lanes.
    """

    def kernel(*refs):
        it = iter(refs)
        x_ref, pos_ref = next(it), next(it)
        lrefs = [(next(it), next(it)) for _ in layer_cfgs]   # (weight slabs, add vec)
        o_ref = next(it)
        pad_ref = next(it)                                   # shared padded scratch

        lanes_max = pad_ref.shape[-1]
        # Zero only the halo rows (re-done every step: on multi-core parts each
        # core owns its own scratch copy, so a program_id()==0 guard is unsafe).
        zhalo = jnp.zeros((pad, lanes_max), jnp.float32)
        pad_ref[BASE - pad:BASE, :] = zhalo
        pad_ref[BASE + T:BASE + T + pad, :] = zhalo

        # positional encoding: broadcast-add of the tiny (1, F*C0) vector
        act = x_ref[...] + pos_ref[...]                      # (T, F*C0) f32

        for cfg, (w_ref, add_ref) in zip(layer_cfgs, lrefs):
            li = F * cfg['cin']                              # input lanes
            lo = F * cfg['cout']                             # output lanes (main path)

            # sublane-ALIGNED bulk store of the activation; halo rows stay zero
            pad_ref[BASE:BASE + T, :li] = act

            # time conv = KT MXU-accumulated matmuls (no lane-concat im2col)
            acc = jnp.dot(pad_ref[BASE - pad:BASE - pad + T, :li].astype(matmul_dtype),
                          w_ref[0], preferred_element_type=jnp.float32)
            for kt in range(1, KT):
                s0 = BASE - pad + kt
                acc = acc + jnp.dot(pad_ref[s0:s0 + T, :li].astype(matmul_dtype),
                                    w_ref[kt], preferred_element_type=jnp.float32)

            # folded bias (+ folded BN shift, + skip bias in the fused case)
            acc = acc + add_ref[...]

            if cfg['skip_mode'] == 'fused':
                # lanes [:lo] = main path, lanes [lo:] = 1x1 skip conv output
                if cfg['apply_act']:
                    lane = lax.broadcasted_iota(jnp.int32, acc.shape, 1)
                    acc = jnp.where(lane < lo, jnp.maximum(acc, 0.0), acc)
                # recombine main + skip with one XLU roll and take the main lanes
                acc = acc + pltpu.roll(acc, shift=lo, axis=1)
                act = acc[:, :lo]
            else:
                if cfg['apply_act']:
                    acc = jnp.maximum(acc, 0.0)
                if cfg['skip_mode'] == 'identity':           # runtime identity skip
                    act = acc + act
                else:                                        # 'folded' (in weight)
                    act = acc

        o_ref[...] = act.astype(o_ref.dtype)

    return kernel


# ---------------------------------------------------------------------------
# Trace-time parameter folding (pure XLA glue, zero kernel cost)
# ---------------------------------------------------------------------------
def _prep_layer(lp, F, KT, pad, matmul_dtype):
    co, ci = int(lp['w'].shape[0]), int(lp['w'].shape[1])
    # Conv2d weight (Co, Ci, F, KT) -> KT slabs of (F*Ci, Co); row index = f*Ci + ci
    w_slabs = jnp.transpose(lp['w'], (3, 2, 1, 0)).reshape(KT, F * ci, co)
    # broadcast the freq-collapsed main-path output over the F mel bins (lane-dense)
    w_main = jnp.tile(w_slabs, (1, 1, F)).astype(jnp.float32)       # (KT, F*Ci, F*Co)

    apply_act = bool(lp['apply_act'])
    if apply_act:
        # fold eval-mode BatchNorm: scale into weight columns, (b*scale+shift) into one add
        w_main = w_main * jnp.tile(lp['scale'], F)[None, None, :]
        add_vec = jnp.tile(lp['b'] * lp['scale'] + lp['shift'], F)
    else:
        add_vec = jnp.tile(lp['b'], F)
    add_vec = add_vec.reshape(1, F * co).astype(jnp.float32)

    if lp['has_skip']:
        skip_mode = 'fused'
        # per-mel 1x1 skip conv fused as F*Co extra output columns (only the
        # kt==pad slab is nonzero); recombined post-ReLU with an XLU roll in-kernel.
        w_skip = jnp.kron(jnp.eye(F, dtype=jnp.float32), lp['ws'].T.astype(jnp.float32))
        skip_cols = jnp.zeros((KT, F * ci, F * co), jnp.float32).at[pad].set(w_skip)
        w_main = jnp.concatenate([w_main, skip_cols], axis=-1)      # (KT, F*Ci, 2*F*Co)
        add_vec = jnp.concatenate(
            [add_vec, jnp.tile(lp['bs'], F).reshape(1, F * co).astype(jnp.float32)],
            axis=-1)
    elif not apply_act:
        skip_mode = 'folded'        # linear identity skip -> absorb into conv weight
        assert ci == co
        w_main = w_main.at[pad].add(jnp.eye(F * ci, dtype=jnp.float32))
    else:
        skip_mode = 'identity'      # identity skip added after the nonlinearity
        assert ci == co

    cfg = dict(cin=ci, cout=co, apply_act=apply_act, skip_mode=skip_mode,
               n_out=int(w_main.shape[-1]))
    return cfg, [w_main.astype(matmul_dtype), add_vec]


def forward_pallas(x_nchw, params, matmul_dtype=jnp.bfloat16):
    B, C0, F, T = x_nchw.shape
    KT = KERNEL
    pad = KERNEL // 2
    assert BASE >= pad and BASE % 8 == 0

    # NCHW -> (B, T, F*C0): time on sublanes, (freq, chan) flattened on lanes.
    x = jnp.transpose(x_nchw, (0, 3, 2, 1)).astype(jnp.float32).reshape(B, T, F * C0)
    pos = (params['freq_emb'].reshape(F, 1) + params['chan_emb'].reshape(1, C0))
    pos = pos.reshape(1, F * C0).astype(jnp.float32)

    layer_cfgs, flat_params = [], []
    for lp in params['layers']:
        cfg, tensors = _prep_layer(lp, F, KT, pad, matmul_dtype)
        layer_cfgs.append(cfg)
        flat_params += tensors
    C_last = layer_cfgs[-1]['cout']

    # one shared padded scratch (region-0), sized for the widest layer input
    max_lanes = F * max(cfg['cin'] for cfg in layer_cfgs)
    rows = BASE + T + 8                                     # 8-row-aligned height

    kernel = _make_kernel(T, F, KT, pad, layer_cfgs, matmul_dtype)

    def const_spec(a):
        n = a.ndim
        return pl.BlockSpec(a.shape, lambda b, n=n: (0,) * n)

    in_specs = ([pl.BlockSpec((None, T, F * C0), lambda b: (b, 0, 0)),
                 const_spec(pos)]
                + [const_spec(a) for a in flat_params])
    out_spec = pl.BlockSpec((None, T, F * C_last), lambda b: (b, 0, 0))

    # explicit VMEM budget (matters on v7x's 64 MiB): double-buffered I/O blocks
    # + resident weights + shared scratch, with generous headroom.
    per_step = (2 * T * F * C0 * 4
                + 2 * T * F * C_last * 4
                + pos.size * 4
                + sum(int(a.size) * a.dtype.itemsize for a in flat_params)
                + rows * max_lanes * 4)
    vmem_limit = int(max(8 * 1024 * 1024, 4 * per_step))

    out = pl.pallas_call(
        kernel,
        out_shape=jax.ShapeDtypeStruct((B, T, F * C_last), jnp.float32),
        grid=(B,),
        in_specs=in_specs,
        out_specs=out_spec,
        scratch_shapes=[pltpu.VMEM((rows, max_lanes), jnp.float32)],
        compiler_params=pltpu.CompilerParams(
            dimension_semantics=("parallel",),
            vmem_limit_bytes=vmem_limit),
    )(x, pos, *flat_params)

    # back to PyTorch NCHW = [B, C, mel, T]
    return jnp.transpose(out.reshape(B, T, F, C_last), (0, 3, 2, 1))


# ---------------------------------------------------------------------------
# Pure-JAX reference (mirrors the PyTorch forward, NCHW)
# ---------------------------------------------------------------------------
def forward_reference(x_nchw, params):
    C0, F = x_nchw.shape[1], x_nchw.shape[2]
    x = (x_nchw + params['chan_emb'].reshape(1, C0, 1, 1)
                + params['freq_emb'].reshape(1, 1, F, 1))
    dn = ('NCHW', 'OIHW', 'NCHW')
    for lp in params['layers']:
        old = x
        pad = lp['time_pad']
        y = lax.conv_general_dilated(x, lp['w'], (1, 1),
                                     ((0, 0), (pad, pad)),
                                     dimension_numbers=dn)
        y = y + lp['b'].reshape(1, -1, 1, 1)
        if lp['apply_act']:
            y = y * lp['scale'].reshape(1, -1, 1, 1) + lp['shift'].reshape(1, -1, 1, 1)
            y = jnp.maximum(y, 0.0)
        if lp['has_skip']:
            ws4 = lp['ws'][:, :, None, None]
            s = lax.conv_general_dilated(old, ws4, (1, 1), ((0, 0), (0, 0)),
                                         dimension_numbers=dn)
            s = s + lp['bs'].reshape(1, -1, 1, 1)
            x = y + s            # broadcast over collapsed mel axis
        else:
            x = y + old          # identity skip (broadcast over mel)
    return x


# ---------------------------------------------------------------------------
# Deterministic parameter init (shapes from the module's __init__)
# ---------------------------------------------------------------------------
def init_params(key):
    n_layers = len(CHANNELS) - 1
    keys = iter(jax.random.split(key, 2 + 4 * n_layers))
    C0 = CHANNELS[0]

    def kaiming(k, shape, fan_in):
        bound = math.sqrt(6.0 / fan_in)
        return jax.random.uniform(k, shape, jnp.float32, -bound, bound)

    params = {
        'chan_emb': kaiming(next(keys), (C0,), C0),       # nn.Parameter (1,C0,1,1)
        'freq_emb': kaiming(next(keys), (BINS,), BINS),   # nn.Parameter (1,1,bins,1)
        'layers': [],
    }
    for k, (ci, co) in enumerate(zip(CHANNELS[:-1], CHANNELS[1:])):
        is_last = (k == n_layers - 1)
        fan_in = ci * BINS * KERNEL
        w = kaiming(next(keys), (co, ci, BINS, KERNEL), fan_in)   # Conv2d weight OIHW
        b = kaiming(next(keys), (co,), fan_in)                    # Conv2d bias
        if ci != co:                                              # skip 1x1 conv
            ws = kaiming(next(keys), (co, ci), ci)
            bs = kaiming(next(keys), (co,), ci)
            has_skip = True
        else:                                                     # identity skip
            _, _ = next(keys), next(keys)
            ws = jnp.eye(ci, dtype=jnp.float32)
            bs = jnp.zeros((co,), jnp.float32)
            has_skip = False
        if not is_last:   # BatchNorm2d(co) at init, eval mode, folded
            scale = jnp.ones((co,), jnp.float32) / jnp.sqrt(1.0 + BN_EPS)
            shift = jnp.zeros((co,), jnp.float32)
        else:             # last layer has no BatchNorm/activation
            scale = jnp.ones((co,), jnp.float32)
            shift = jnp.zeros((co,), jnp.float32)
        params['layers'].append(dict(
            w=w, b=b, ws=ws, bs=bs, scale=scale, shift=shift,
            has_skip=has_skip, apply_act=not is_last, time_pad=KERNEL // 2))
    return params


if __name__ == "__main__":
    key = jax.random.PRNGKey(0)
    kx, kp = jax.random.split(key)

    B, T = 2, 16
    x = jax.random.normal(kx, (B, CHANNELS[0], BINS, T), jnp.float32)  # NCHW
    params = init_params(kp)

    ref = jax.block_until_ready(forward_reference(x, params))

    # exact-semantics check (f32 matmuls)
    out_f32 = jax.block_until_ready(forward_pallas(x, params, matmul_dtype=jnp.float32))
    assert out_f32.shape == (B, CHANNELS[-1], BINS, T), out_f32.shape
    np.testing.assert_allclose(np.asarray(out_f32), np.asarray(ref),
                               rtol=1e-4, atol=1e-4)

    # fast path: bf16 matmul operands with f32 accumulation (looser tolerance is
    # purely bf16 operand-rounding; structure/layout errors would be O(1) off)
    out_bf16 = jax.block_until_ready(forward_pallas(x, params, matmul_dtype=jnp.bfloat16))
    np.testing.assert_allclose(np.asarray(out_bf16), np.asarray(ref),
                               rtol=1e-1, atol=2e-1)

    print("KERNEL_OK")
</pallas_src>

<mosaic_0001>
module attributes {stable_mosaic.version = 11 : i64} {
  func.func @kernel(%arg0: i32, %arg1: memref<1x16x32xf32, #tpu.memory_space<vmem>>, %arg2: memref<1x32xf32, #tpu.memory_space<vmem>>, %arg3: memref<3x32x128xf32, #tpu.memory_space<vmem>>, %arg4: memref<1x128xf32, #tpu.memory_space<vmem>>, %arg5: memref<3x64x64xf32, #tpu.memory_space<vmem>>, %arg6: memref<1x64xf32, #tpu.memory_space<vmem>>, %arg7: memref<1x16x64xf32, #tpu.memory_space<vmem>>, %arg8: memref<32x64xf32, #tpu.memory_space<vmem>>) attributes {dimension_semantics = [#tpu.dimension_semantics<parallel>], iteration_bounds = array<i64: 2>, scalar_prefetch = 0 : i64, scratch_operands = 1 : i64, tpu.core_type = #tpu.core_type<tc>, window_params = [{transform_indices = @transform_0, window_bounds = array<i64: 1, 16, 32>}, {pipeline_mode = #tpu.pipeline_mode<synchronous>, transform_indices = @transform_1, window_bounds = array<i64: 1, 32>}, {pipeline_mode = #tpu.pipeline_mode<synchronous>, transform_indices = @transform_2, window_bounds = array<i64: 3, 32, 128>}, {pipeline_mode = #tpu.pipeline_mode<synchronous>, transform_indices = @transform_3, window_bounds = array<i64: 1, 128>}, {pipeline_mode = #tpu.pipeline_mode<synchronous>, transform_indices = @transform_4, window_bounds = array<i64: 3, 64, 64>}, {pipeline_mode = #tpu.pipeline_mode<synchronous>, transform_indices = @transform_5, window_bounds = array<i64: 1, 64>}, {transform_indices = @transform_6, window_bounds = array<i64: 1, 16, 64>}]} {
    %cst = arith.constant 0.000000e+00 : f32
    %0 = vector.broadcast %cst : f32 to vector<1x64xf32>
    %c7 = arith.constant 7 : index
    %c0 = arith.constant 0 : index
    %1 = vector.load %arg8[%c7, %c0] : memref<32x64xf32, #tpu.memory_space<vmem>>, vector<1x64xf32>
    tpu.vector_store %arg8[%c7, %c0], %0 {strides = array<i32>} : memref<32x64xf32, #tpu.memory_space<vmem>>, vector<1x64xf32>,
    %c24 = arith.constant 24 : index
    %c0_0 = arith.constant 0 : index
    %2 = vector.load %arg8[%c24, %c0_0] : memref<32x64xf32, #tpu.memory_space<vmem>>, vector<1x64xf32>
    tpu.vector_store %arg8[%c24, %c0_0], %0 {strides = array<i32>} : memref<32x64xf32, #tpu.memory_space<vmem>>, vector<1x64xf32>,
    %c0_1 = arith.constant 0 : index
    %c0_2 = arith.constant 0 : index
    %c0_3 = arith.constant 0 : index
    %3 = vector.load %arg1[%c0_1, %c0_2, %c0_3] : memref<1x16x32xf32, #tpu.memory_space<vmem>>, vector<1x16x32xf32>
    %4 = vector.shape_cast %3 : vector<1x16x32xf32> to vector<16x32xf32>
    %c0_4 = arith.constant 0 : index
    %c0_5 = arith.constant 0 : index
    %5 = vector.load %arg2[%c0_4, %c0_5] : memref<1x32xf32, #tpu.memory_space<vmem>>, vector<1x32xf32>
    %6 = vector.broadcast %5 : vector<1x32xf32> to vector<16x32xf32>
    %7 = arith.addf %4, %6 : vector<16x32xf32>
    %c8 = arith.constant 8 : index
    %c0_6 = arith.constant 0 : index
    %8 = vector.load %arg8[%c8, %c0_6] : memref<32x64xf32, #tpu.memory_space<vmem>>, vector<16x32xf32>
    tpu.vector_store %arg8[%c8, %c0_6], %7 {strides = array<i32>} : memref<32x64xf32, #tpu.memory_space<vmem>>, vector<16x32xf32>,
    %c7_7 = arith.constant 7 : index
    %c0_8 = arith.constant 0 : index
    %9 = vector.load %arg8[%c7_7, %c0_8] : memref<32x64xf32, #tpu.memory_space<vmem>>, vector<16x32xf32>
    %c0_9 = arith.constant 0 : index
    %c0_10 = arith.constant 0 : index
    %c0_11 = arith.constant 0 : index
    %10 = vector.load %arg3[%c0_9, %c0_10, %c0_11] : memref<3x32x128xf32, #tpu.memory_space<vmem>>, vector<1x32x128xf32>
    %11 = vector.shape_cast %10 : vector<1x32x128xf32> to vector<32x128xf32>
    %cst_12 = arith.constant dense<0.000000e+00> : vector<16x128xf32>
    %12 = tpu.matmul %9, %11, %cst_12 {dimension_numbers = #tpu.dot_dimension_numbers<[1], [0], [0], [1], [0, 0, 1, 1], [], []>} : vector<16x32xf32>, vector<32x128xf32>, vector<16x128xf32> -> vector<16x128xf32>
    %c8_13 = arith.constant 8 : index
    %c0_14 = arith.constant 0 : index
    %13 = vector.load %arg8[%c8_13, %c0_14] : memref<32x64xf32, #tpu.memory_space<vmem>>, vector<16x32xf32>
    %c1 = arith.constant 1 : index
    %c0_15 = arith.constant 0 : index
    %c0_16 = arith.constant 0 : index
    %14 = vector.load %arg3[%c1, %c0_15, %c0_16] : memref<3x32x128xf32, #tpu.memory_space<vmem>>, vector<1x32x128xf32>
    %15 = vector.shape_cast %14 : vector<1x32x128xf32> to vector<32x128xf32>
    %cst_17 = arith.constant dense<0.000000e+00> : vector<16x128xf32>
    %16 = tpu.matmul %13, %15, %cst_17 {dimension_numbers = #tpu.dot_dimension_numbers<[1], [0], [0], [1], [0, 0, 1, 1], [], []>} : vector<16x32xf32>, vector<32x128xf32>, vector<16x128xf32> -> vector<16x128xf32>
    %17 = arith.addf %12, %16 : vector<16x128xf32>
    %c9 = arith.constant 9 : index
    %c0_18 = arith.constant 0 : index
    %18 = vector.load %arg8[%c9, %c0_18] : memref<32x64xf32, #tpu.memory_space<vmem>>, vector<16x32xf32>
    %c2 = arith.constant 2 : index
    %c0_19 = arith.constant 0 : index
    %c0_20 = arith.constant 0 : index
    %19 = vector.load %arg3[%c2, %c0_19, %c0_20] : memref<3x32x128xf32, #tpu.memory_space<vmem>>, vector<1x32x128xf32>
    %20 = vector.shape_cast %19 : vector<1x32x128xf32> to vector<32x128xf32>
    %cst_21 = arith.constant dense<0.000000e+00> : vector<16x128xf32>
    %21 = tpu.matmul %18, %20, %cst_21 {dimension_numbers = #tpu.dot_dimension_numbers<[1], [0], [0], [1], [0, 0, 1, 1], [], []>} : vector<16x32xf32>, vector<32x128xf32>, vector<16x128xf32> -> vector<16x128xf32>
    %22 = arith.addf %17, %21 : vector<16x128xf32>
    %c0_22 = arith.constant 0 : index
    %c0_23 = arith.constant 0 : index
    %23 = vector.load %arg4[%c0_22, %c0_23] : memref<1x128xf32, #tpu.memory_space<vmem>>, vector<1x128xf32>
    %24 = vector.broadcast %23 : vector<1x128xf32> to vector<16x128xf32>
    %25 = arith.addf %22, %24 : vector<16x128xf32>
    %26 = tpu.iota {dimensions = array<i32: 1>} : vector<16x128xi32>
    %c64_i32 = arith.constant 64 : i32
    %27 = vector.broadcast %c64_i32 : i32 to vector<16x128xi32>
    %28 = arith.cmpi slt, %26, %27 : vector<16x128xi32>
    %cst_24 = arith.constant 0.000000e+00 : f32
    %29 = vector.broadcast %cst_24 : f32 to vector<16x128xf32>
    %30 = arith.maximumf %25, %29 : vector<16x128xf32>
    %31 = arith.select %28, %30, %25 : vector<16x128xi1>, vector<16x128xf32>
    %c64_i32_25 = arith.constant 64 : i32
    %32 = tpu.dynamic_rotate %31 by %c64_i32_25 dim 1 : vector<16x128xf32>, i32 -> vector<16x128xf32>
    %33 = arith.addf %31, %32 : vector<16x128xf32>
    %34 = vector.extract_strided_slice %33 {offsets = [0, 0], sizes = [16, 64], strides = [1, 1]} : vector<16x128xf32> to vector<16x64xf32>
    %c8_26 = arith.constant 8 : index
    %c0_27 = arith.constant 0 : index
    %35 = vector.load %arg8[%c8_26, %c0_27] : memref<32x64xf32, #tpu.memory_space<vmem>>, vector<16x64xf32>
    tpu.vector_store %arg8[%c8_26, %c0_27], %34 {strides = array<i32>} : memref<32x64xf32, #tpu.memory_space<vmem>>, vector<16x64xf32>,
    %c7_28 = arith.constant 7 : index
    %c0_29 = arith.constant 0 : index
    %36 = vector.load %arg8[%c7_28, %c0_29] : memref<32x64xf32, #tpu.memory_space<vmem>>, vector<16x64xf32>
    %c0_30 = arith.constant 0 : index
    %c0_31 = arith.constant 0 : index
    %c0_32 = arith.constant 0 : index
    %37 = vector.load %arg5[%c0_30, %c0_31, %c0_32] : memref<3x64x64xf32, #tpu.memory_space<vmem>>, vector<1x64x64xf32>
    %38 = vector.shape_cast %37 : vector<1x64x64xf32> to vector<64x64xf32>
    %cst_33 = arith.constant dense<0.000000e+00> : vector<16x64xf32>
    %39 = tpu.matmul %36, %38, %cst_33 {dimension_numbers = #tpu.dot_dimension_numbers<[1], [0], [0], [1], [0, 0, 1, 1], [], []>} : vector<16x64xf32>, vector<64x64xf32>, vector<16x64xf32> -> vector<16x64xf32>
    %c8_34 = arith.constant 8 : index
    %c0_35 = arith.constant 0 : index
    %40 = vector.load %arg8[%c8_34, %c0_35] : memref<32x64xf32, #tpu.memory_space<vmem>>, vector<16x64xf32>
    %c1_36 = arith.constant 1 : index
    %c0_37 = arith.constant 0 : index
    %c0_38 = arith.constant 0 : index
    %41 = vector.load %arg5[%c1_36, %c0_37, %c0_38] : memref<3x64x64xf32, #tpu.memory_space<vmem>>, vector<1x64x64xf32>
    %42 = vector.shape_cast %41 : vector<1x64x64xf32> to vector<64x64xf32>
    %cst_39 = arith.constant dense<0.000000e+00> : vector<16x64xf32>
    %43 = tpu.matmul %40, %42, %cst_39 {dimension_numbers = #tpu.dot_dimension_numbers<[1], [0], [0], [1], [0, 0, 1, 1], [], []>} : vector<16x64xf32>, vector<64x64xf32>, vector<16x64xf32> -> vector<16x64xf32>
    %44 = arith.addf %39, %43 : vector<16x64xf32>
    %c9_40 = arith.constant 9 : index
    %c0_41 = arith.constant 0 : index
    %45 = vector.load %arg8[%c9_40, %c0_41] : memref<32x64xf32, #tpu.memory_space<vmem>>, vector<16x64xf32>
    %c2_42 = arith.constant 2 : index
    %c0_43 = arith.constant 0 : index
    %c0_44 = arith.constant 0 : index
    %46 = vector.load %arg5[%c2_42, %c0_43, %c0_44] : memref<3x64x64xf32, #tpu.memory_space<vmem>>, vector<1x64x64xf32>
    %47 = vector.shape_cast %46 : vector<1x64x64xf32> to vector<64x64xf32>
    %cst_45 = arith.constant dense<0.000000e+00> : vector<16x64xf32>
    %48 = tpu.matmul %45, %47, %cst_45 {dimension_numbers = #tpu.dot_dimension_numbers<[1], [0], [0], [1], [0, 0, 1, 1], [], []>} : vector<16x64xf32>, vector<64x64xf32>, vector<16x64xf32> -> vector<16x64xf32>
    %49 = arith.addf %44, %48 : vector<16x64xf32>
    %c0_46 = arith.constant 0 : index
    %c0_47 = arith.constant 0 : index
    %50 = vector.load %arg6[%c0_46, %c0_47] : memref<1x64xf32, #tpu.memory_space<vmem>>, vector<1x64xf32>
    %51 = vector.broadcast %50 : vector<1x64xf32> to vector<16x64xf32>
    %52 = arith.addf %49, %51 : vector<16x64xf32>
    %c0_48 = arith.constant 0 : index
    %c0_49 = arith.constant 0 : index
    %c0_50 = arith.constant 0 : index
    %53 = vector.load %arg7[%c0_48, %c0_49, %c0_50] : memref<1x16x64xf32, #tpu.memory_space<vmem>>, vector<1x16x64xf32>
    %54 = vector.shape_cast %53 : vector<1x16x64xf32> to vector<16x64xf32>
    %55 = vector.shape_cast %52 : vector<16x64xf32> to vector<1x16x64xf32>
    tpu.vector_store %arg7[%c0_48, %c0_49, %c0_50], %55 {strides = array<i32>} : memref<1x16x64xf32, #tpu.memory_space<vmem>>, vector<1x16x64xf32>,
    return
  }
  func.func @transform_0(%arg0: i32) -> (i32, i32, i32) {
    %c0_i32 = arith.constant 0 : i32
    %c0_i32_0 = arith.constant 0 : i32
    %c0_i32_1 = arith.constant 0 : i32
    return %arg0, %c0_i32, %c0_i32_0 : i32, i32, i32
  }
  func.func @transform_1(%arg0: i32) -> (i32, i32) {
    %c0_i32 = arith.constant 0 : i32
    %c0_i32_0 = arith.constant 0 : i32
    %c0_i32_1 = arith.constant 0 : i32
    return %c0_i32, %c0_i32_0 : i32, i32
  }
  func.func @transform_2(%arg0: i32) -> (i32, i32, i32) {
    %c0_i32 = arith.constant 0 : i32
    %c0_i32_0 = arith.constant 0 : i32
    %c0_i32_1 = arith.constant 0 : i32
    %c0_i32_2 = arith.constant 0 : i32
    return %c0_i32, %c0_i32_0, %c0_i32_1 : i32, i32, i32
  }
  func.func @transform_3(%arg0: i32) -> (i32, i32) {
    %c0_i32 = arith.constant 0 : i32
    %c0_i32_0 = arith.constant 0 : i32
    %c0_i32_1 = arith.constant 0 : i32
    return %c0_i32, %c0_i32_0 : i32, i32
  }
  func.func @transform_4(%arg0: i32) -> (i32, i32, i32) {
    %c0_i32 = arith.constant 0 : i32
    %c0_i32_0 = arith.constant 0 : i32
    %c0_i32_1 = arith.constant 0 : i32
    %c0_i32_2 = arith.constant 0 : i32
    return %c0_i32, %c0_i32_0, %c0_i32_1 : i32, i32, i32
  }
  func.func @transform_5(%arg0: i32) -> (i32, i32) {
    %c0_i32 = arith.constant 0 : i32
    %c0_i32_0 = arith.constant 0 : i32
    %c0_i32_1 = arith.constant 0 : i32
    return %c0_i32, %c0_i32_0 : i32, i32
  }
  func.func @transform_6(%arg0: i32) -> (i32, i32, i32) {
    %c0_i32 = arith.constant 0 : i32
    %c0_i32_0 = arith.constant 0 : i32
    %c0_i32_1 = arith.constant 0 : i32
    return %arg0, %c0_i32, %c0_i32_0 : i32, i32, i32
  }
}

</mosaic_0001>

<bundles_post_ra>
// kernel: tpu_custom_call.1
= control target key start
LH: loop header
LB: loop body
LE: loop exit
PB: predicated region body
PF: predicated region fallthrough
CT: control target
= control target key end

     0   :  { %11 = vsyncpa [#allocation4], 0  ;;  %s1669_s0 = inlined_call_operand.hbm [shape: f32[2,16,32], index: 0, kind: input, shape index: {}]   ;;  %s1670_s1 = inlined_call_operand.vmem [shape: f32[1,32], index: 1, kind: input, shape index: {}]   ;;  %s1671_s2 = inlined_call_operand.hbm [shape: f32[3,32,128], index: 2, kind: input, shape index: {}]   ;;  %s1672_s3 = inlined_call_operand.vmem [shape: f32[1,128], index: 3, kind: input, shape index: {}]   ;;  %s1673_s4 = inlined_call_operand.hbm [shape: f32[3,64,64], index: 4, kind: input, shape index: {}]   ;;  %s1674_s5 = inlined_call_operand.vmem [shape: f32[1,64], index: 5, kind: input, shape index: {}]   ;;  %s1675_s6 = inlined_call_operand.hbm [shape: f32[2,16,64], index: 6, kind: output, shape index: {}]  }
   0x1   :  { %13 = vsyncpa [#allocation4 + $0x1], 0 }
   0x2   :  { %14 = vsyncpa [#allocation7], 0 }
   0x3   :  { %15 = vsyncpa [#allocation5], 0 }
   0x4   :  { %17 = vsyncpa [#allocation5 + $0x1], 0  ;;  %s1441_s21 = smov 0   ;;  %s1443_s22 = smov 0  }
   0x5   :  { %s1445_s23 = smov 0   ;;  %s1447_s24 = smov 0  }
   0x6 LB: > { %s1462_s25 = sadd.s32 4294967295, %s1394_s24   ;;  %s1000_s26 = sadd.s32 4294967294, %s1394_s24   ;;  %s1394_s24 = sphi %s1447_s24, %s1700_s24   ;;  %s1390_s23 = sphi %s1445_s23, %s1699_s23   ;;  %s1386_s22 = sphi %s1443_s22, %s1698_s22   ;;  %s1382_s21 = sphi %s1441_s21, %s1697_s21  }
   0x7   : > { %p43_p0 = scmp.ne.s32.totalorder %s1386_s22, %s1382_s21  ;;  %p1676_p1 = scmp.eq.s32.totalorder %s1462_s25, 0 }
   0x8   : > { %p172_p2 = scmp.eq.s32.totalorder %s1462_s25, 1  ;;  %p178_p3 = scmp.eq.s32.totalorder %s1000_s26, 1 }
   0x9   : > { %p1471_p4 = por %p1676_p1, %p43_p0  ;;  %p1001_p5 = scmp.ge.s32.totalorder %s1394_s24, 1 }
   0xa   : > { %p1476_p6 = por %p178_p3, %p43_p0  ;;  %p185_p7 = scmp.lt.s32.totalorder %s1394_s24, 3 }
   0xb   : > { %s1682_s27 = scalar_select %p1471_p4, 1, 0 }
   0xc   : > { %s1683_s28 = scalar_select %p1476_p6, 1, 0 }
   0xd   : > { %p1481_p8 = pnand %p1001_p5, %p185_p7  ;;  %s1396_s30 = smov [#allocation6]  }
   0xe   : > { %s200_s7 = sshll.u32 %s1396_s30, 4  ;;  %s1397_s9 = smov [#allocation8]   ;;  %s201_s7 = int_to_ptr.vmem [resolvable:$true] %s200_s7 }
   0xf   : > { %s1684_s29 = scalar_select %p1481_p8, 1, 0 }
  0x10   : > { %p1185_p9 = pneg %p1481_p8  ;;  %s216_s10 = sshll.u32 %s1397_s9, 4  ;;  %s217_s10 = int_to_ptr.vmem [resolvable:$true] %s216_s10 }
  0x11   : > { %s1257_s11 = scalar_lea.vmem %s201_s7, 1536  ;;  %p1265_p5 = scmp.lt.s32.totalorder %s201_s7, %s201_s7 }
  0x12   : > { %p1490_p11 = pnand %p1185_p9, %p1676_p1  ;;  %p1258_p13 = scmp.ne.s32.totalorder %s201_s7, %s1257_s11 }
  0x13   : > { %p1266_p7 = scmp.lt.s32.totalorder %s1257_s11, %s1257_s11 }
  0x14   : > { %p1248_p12 = pneg %p1490_p11 }
  0x15   : > { %p1267_p10 = por %p1266_p7, %p1265_p5 }
  0x16   : > { %p1260_p0 = pnand %p1258_p13, %p1248_p12 }
  0x18   : > { %p1261_p3 = pneg %p1260_p0 }
  0x1a   : > { %p1268_p9 = pnand %p1267_p10, %p1261_p3 }
  0x1c   : > { %1271 = shalt.err (!%p1268_p9)
}
  0x1d   : > { %s1677_s12 = smov 128   ;;  %s1678_s13 = smov 8  }
  0x1e   : > { %1188 = dma.hbm_to_vmem [thread:$0]  (!%p1490_p11), %s1671_s2, 1536, %s201_s7, [#allocation7], %s1677_s12, %s1677_s12, %s1678_s13  }
  0x1f   : > { %s1283_s16 = scalar_lea.vmem %s217_s10, 3072  ;;  %p1291_p10 = scmp.lt.s32.totalorder %s217_s10, %s217_s10 }
  0x20   : > { %p1284_p13 = scmp.ne.s32.totalorder %s217_s10, %s1283_s16  ;;  %p1292_p3 = scmp.lt.s32.totalorder %s1283_s16, %s1283_s16 }
  0x22   : > { %p1286_p0 = pnand %p1284_p13, %p1248_p12  ;;  %p1293_p7 = por %p1292_p3, %p1291_p10 }
  0x24   : > { %p1287_p5 = pneg %p1286_p0 }
  0x26   : > { %p1294_p9 = pnand %p1293_p7, %p1287_p5 }
  0x28   : > { %1297 = shalt.err (!%p1294_p9)
}
  0x29   : > { %1191 = dma.hbm_to_vmem [thread:$0]  (!%p1490_p11), %s1673_s4, 3072, %s217_s10, [#allocation7], %s1677_s12, %s1677_s12, %s1678_s13  }
  0x2a   : > { %s1519_s19 = sadd.s32 1, %s1394_s24   ;;  %s30_s20 = sadd.s32 1, %s1390_s23 }
  0x2b   : > { %s27_s26 = ssub.s32 %s1394_s24, %s1519_s19  ;;  %p37_p12 = scmp.ne.s32.totalorder %s1390_s23, %s1386_s22 }
  0x2c   : > { %p28_p13 = scmp.eq.s32.totalorder %s27_s26, 0  ;;  %p38_p0 = scmp.eq.s32.totalorder %s1394_s24, 0 }
  0x2d   : > { %p1529_p5 = por %p172_p2, %p37_p12  ;;  %p1202_p10 = scmp.lt.s32.totalorder %s1394_s24, 2 }
  0x2e   : > { %s1535_s7 = scalar_select %p28_p13, %s1390_s23, %s30_s20  }
  0x2f   : > { %s1686_s30 = scalar_select %p1529_p5, 1, 0 }
  0x30   : > { %p39_p3 = por %p38_p0, %p37_p12  ;;  %s233_s8 = sand.u32 1, %s1390_s23  }
  0x31   : > { %s1005_s9 = sshll.u32 %s233_s8, 4  ;;  %s1033_s10 = sshll.u32 %s1394_s24, 8 }
  0x32   : > { %s1542_s15 = scalar_lea.hbm %s1669_s0, %s1033_s10  ;;  %s237_s16 = scalar_lea.vmem [#allocation3], %s1005_s9 }
  0x33   : > { %s244_s17 = sshll.u32 %s237_s16, 4  ;;  %p1546_p2 = pnand %p1202_p10, %p39_p3  ;;  %s1544_s17 = int_to_ptr.vmem [resolvable:$true] %s244_s17 }
  0x34   : > { %s1550_s20 = scalar_lea.sflag [#allocation4], %s233_s8  ;;  %s1298_s26 = scalar_lea.hbm %s1542_s15, 256 }
  0x35   : > { %p1299_p11 = scmp.ne.s32.totalorder %s1542_s15, %s1298_s26  ;;  %p1300_p7 = pneg %p1546_p2 }
  0x36   : > { %s1303_s9 = scalar_lea.hbm %s1669_s0, 512  ;;  %p1304_p13 = scmp.lt.s32.totalorder %s1542_s15, %s1669_s0 }
  0x37   : > { %p1301_p9 = pnand %p1300_p7, %p1299_p11  ;;  %p1305_p0 = scmp.lt.s32.totalorder %s1303_s9, %s1298_s26 }
  0x39   : > { %p1302_p12 = pneg %p1301_p9  ;;  %p1306_p10 = por %p1305_p0, %p1304_p13 }
  0x3b   : > { %p1307_p3 = pnand %p1306_p10, %p1302_p12 }
  0x3d   : > { %1310 = shalt.err (!%p1307_p3)
}
  0x3e   : > { %s1311_s8 = scalar_lea.vmem %s1544_s17, 256  ;;  %s1400_s12 = smov [#allocation3]  }
  0x3f   : > { %p1312_p1 = scmp.ne.s32.totalorder %s1544_s17, %s1311_s8  ;;  %s1316_s13 = sshll.u32 %s1400_s12, 4  ;;  %s1317_s13 = int_to_ptr.vmem [resolvable:$false] %s1316_s13 }
  0x40   : > { %s1318_s10 = scalar_lea.vmem %s1317_s13, 512  ;;  %p1319_p9 = scmp.lt.s32.totalorder %s1544_s17, %s1317_s13 }
  0x41   : > { %p1314_p6 = pnand %p1312_p1, %p1300_p7  ;;  %p1320_p5 = scmp.lt.s32.totalorder %s1318_s10, %s1311_s8 }
  0x43   : > { %p1315_p11 = pneg %p1314_p6  ;;  %p1321_p4 = por %p1320_p5, %p1319_p9 }
  0x45   : > { %p1322_p8 = pnand %p1321_p4, %p1315_p11 }
  0x47   : > { %1325 = shalt.err (!%p1322_p8)
}
  0x48   : > { %s1688_s26 = smov 8   ;;  %s1689_s11 = smov 128  }
  0x49   : > { %1195 = dma.hbm_to_vmem [thread:$0]  (!%p1546_p2), %s1542_s15, 256, %s1544_s17, %s1550_s20, %s1689_s11, %s1689_s11, %s1688_s26  }
  0x4a   : > { %p1690_p1 = scmp.ne.s32.totalorder %s1684_s29, 0 }
  0x4b   : > { %s1577_s12 = sand.u32 (!%p1690_p1), 1, %s1386_s22   ;;  %p1691_p4 = scmp.ne.s32.totalorder (!%p1690_p1), %s1682_s27, 0 }
  0x4c   : > { %256 = sbr.rel (%p1690_p1) target bundleno = 668 (0x29c), region = 44  ;;  %s1009_s13 = sshll.u32 (!%p1690_p1), %s1577_s12, 4 }
  0x4d   : > { %s259_s9 = scalar_lea.sflag (!%p1690_p1), [#allocation4], %s1577_s12  ;;  %s262_s18 = scalar_lea.vmem (!%p1690_p1), [#allocation3], %s1009_s13 }
  0x51   : > { %1369 = dma.done.wait (%p1691_p4), %s259_s9, 256  }
  0x52   : > { %1371 = vsyncadd (%p1691_p4), %s259_s9, 4294967040  ;;  %p1692_p6 = scmp.eq.s32.totalorder %s1462_s25, 0 }
  0x54   : > { %1373 = dma.done.wait (%p1692_p6), [#allocation7], 4608   ;;  %p1693_p8 = pmov %p1692_p6 }
  0x55   : > { %vm299_vm0 = vcmask 516096   ;;  %v1401_v0 = vmov 0.0   ;;  %v328_v1 = vld [vmem:[#allocation6 + $0x38] sm:$0xff]  ;;  %v327_v3 = vld [vmem:[#allocation6 + $0x30] sm:$0xff]  ;;  %v326_v5 = vld [vmem:[#allocation6 + $0x28] sm:$0xff]  ;;  %vm313_vm1 = vcmask 261120   ;;  %v590_v37 = vlaneseq }
  0x56   : > { %1375 = vsyncadd (%p1693_p8), [#allocation7], 4294962688  ;;  %300 = vst.msk [vmem:[#allocation2 + $0x7] sm:$0x1] %vm299_vm0, %v1401_v0  ;;  %v321_v2 = vld [vmem:[#allocation6 + $0x18] sm:$0xff]  ;;  %1083 = vmatprep.subr.mxu0 %v328_v1  ;;  %v320_v4 = vld [vmem:[#allocation6 + $0x10] sm:$0xff] }
  0x57   : > { %301 = vst.msk [vmem:[#allocation2 + $0x18] sm:$0x1] %vm299_vm0, %v1401_v0  ;;  %1094 = vmatprep.subr.mxu1 %v321_v2  ;;  %1084 = vmatpush3.msra.mxu0 %v328_v1  ;;  %v319_v6 = vld [vmem:[#allocation6 + $0x8] sm:$0xff]  ;;  %v302_v7 = vld [vmem:[%s262_s18] sm:$0xff]  ;;  %v497_v14 = vld [vmem:[#allocation6 + $0x58] sm:$0xff]  ;;  %v591_v49 = vand.u32 127, %v590_v37 }
  0x58   : > { %1095 = vmatpush3.msra.mxu1 %v321_v2  ;;  %1085 = vmatprep.subr.mxu0 %v327_v3  ;;  %v303_v8 = vld [vmem:[%s262_s18 + $0x8] sm:$0xff]  ;;  %v1013_v9 = vld [vmem:[%s1670_s1] ss:$0 sm:$0xff]  ;;  %v496_v19 = vld [vmem:[#allocation6 + $0x50] sm:$0xff]  ;;  %s1402_s20 = smov 64   ;;  %vm603_vm3 = vcmask 523264  }
  0x59   : > { %1096 = vmatprep.subr.mxu1 %v320_v4  ;;  %1086 = vmatpush3.msra.mxu0 %v327_v3  ;;  %v325_v10 = vld [vmem:[#allocation6 + $0x20] sm:$0xff]  ;;  %v311_v12 = vadd.f32 %v1013_v9, %v302_v7  ;;  %v312_v13 = vadd.f32 %v1013_v9, %v303_v8  ;;  %v495_v21 = vld [vmem:[#allocation6 + $0x48] sm:$0xff]  ;;  %v626_v24 = vld [vmem:[#allocation8 + $0x78] sm:$0xff]  ;;  %vm592_vm2 = vcmp.lt.s32.totalorder %v591_v49, 64  ;;  %s1034_s8 = sshll.u32 %s1462_s25, 8  ;;  %s298_s10 = scalar_lea.vmem [#allocation9], %s1009_s13 }
  0x5a   : > { %1097 = vmatpush3.msra.mxu1 %v320_v4  ;;  %v318_v11 = vld [vmem:[#allocation6] sm:$0xff]  ;;  %1087 = vmatprep.subr.mxu0 %v326_v5  ;;  %v615_v25 = vld [vmem:[#allocation8 + $0x38] sm:$0xff]  ;;  %v625_v26 = vld [vmem:[#allocation8 + $0x70] sm:$0xff]  ;;  %s908_s26 = sshll.u32 %s298_s10, 4  ;;  %s1622_s18 = scalar_lea.hbm %s1675_s6, %s1034_s8  ;;  %s1624_s26 = int_to_ptr.vmem [resolvable:$true] %s908_s26 }
  0x5b   : > { %1098 = vmatprep.subr.mxu1 %v319_v6  ;;  %1088 = vmatpush3.msra.mxu0 %v326_v5  ;;  %314 = vst.msk [vmem:[#allocation2 + $0x8] sm:$0xff] %vm313_vm1, %v311_v12  ;;  %315 = vst.msk [vmem:[#allocation2 + $0x10] sm:$0xff] %vm313_vm1, %v312_v13  ;;  %v494_v22 = vld [vmem:[#allocation6 + $0x40] sm:$0xff]  ;;  %v614_v29 = vld [vmem:[#allocation8 + $0x30] sm:$0xff]  ;;  %s895_s25 = scalar_lea.sflag [#allocation5], %s1577_s12  ;;  %s1326_s13 = scalar_lea.vmem %s1624_s26, 256 }
  0x5c   : > { %1099 = vmatpush3.msra.mxu1 %v319_v6  ;;  %1089 = vmatprep.subr.mxu0 %v325_v10  ;;  %v624_v30 = vld [vmem:[#allocation8 + $0x68] sm:$0xff]  ;;  %v623_v32 = vld [vmem:[#allocation8 + $0x60] sm:$0xff]  ;;  %v622_v41 = vld [vmem:[#allocation8 + $0x58] sm:$0xff]  ;;  %p1327_p5 = scmp.ne.s32.totalorder %s1624_s26, %s1326_s13  ;;  %p1694_p2 = scmp.ne.s32.totalorder %s1686_s30, 0 }
  0x5d   : > { %1100 = vmatprep.subr.mxu1 %v318_v11  ;;  %1090 = vmatpush3.msra.mxu0 %v325_v10  ;;  %v613_v31 = vld [vmem:[#allocation8 + $0x28] sm:$0xff]  ;;  %v612_v38 = vld [vmem:[#allocation8 + $0x20] sm:$0xff]  ;;  %v611_v42 = vld [vmem:[#allocation8 + $0x18] sm:$0xff]  ;;  %s1403_s27 = smov [#allocation9]  }
  0x5e   : > { %1101 = vmatpush3.msra.mxu1 %v318_v11  ;;  %1105 = vmatprep.subr.mxu0 %v497_v14  ;;  %v621_v43 = vld [vmem:[#allocation8 + $0x50] sm:$0xff]  ;;  %v1020_v44 = vld [vmem:[%s1672_s3] ss:$0 sm:$0xff]  ;;  %v620_v48 = vld [vmem:[#allocation8 + $0x48] sm:$0xff]  ;;  %p1328_p7 = pnand %p1327_p5, %p1694_p2  ;;  %s1330_s29 = sshll.u32 %s1403_s27, 4  ;;  %s1331_s29 = int_to_ptr.vmem [resolvable:$false] %s1330_s29 }
  0x5f   : > { %1116 = vmatprep.subr.mxu1 %v626_v24  ;;  %v610_v46 = vld [vmem:[#allocation8 + $0x10] sm:$0xff]  ;;  %v609_v52 = vld [vmem:[#allocation8 + $0x8] sm:$0xff]  ;;  %v619_v54 = vld [vmem:[#allocation8 + $0x40] sm:$0xff]  ;;  %s1332_s15 = scalar_lea.vmem %s1331_s29, 512  ;;  %p1333_p13 = scmp.lt.s32.totalorder %s1624_s26, %s1331_s29 }
  0x60   : > { %v608_v55 = vld [vmem:[#allocation8] sm:$0xff]  ;;  %v799_v56 = vld [vmem:[#allocation8 + $0xb8] sm:$0xff]  ;;  %v798_v2 = vld [vmem:[#allocation8 + $0xb0] sm:$0xff]  ;;  %p1329_p12 = pneg %p1328_p7  ;;  %p1334_p0 = scmp.lt.s32.totalorder %s1332_s15, %s1326_s13 }
  0x61   : > { %v797_v6 = vld [vmem:[#allocation8 + $0xa8] sm:$0xff]  ;;  %v796_v7 = vld [vmem:[#allocation8 + $0xa0] sm:$0xff]  ;;  %v795_v8 = vld [vmem:[#allocation8 + $0x98] sm:$0xff] }
  0x62   : > { %v322_v15 = vld [vmem:[#allocation2 + $0x8] sm:$0xff]  ;;  %v323_v17 = vld [vmem:[#allocation2 + $0x10] sm:$0xff]  ;;  %v792_v11 = vld [vmem:[#allocation8 + $0x80] sm:$0xff]  ;;  %p1335_p10 = por %p1334_p0, %p1333_p13 }
  0x63   : > { %v316_v16 = vld [vmem:[#allocation2 + $0x7] sm:$0xff]  ;;  %1091 = vmatprep.mubr.msk.f32.mxu0 %vm313_vm1, %v322_v15  ;;  %v317_v18 = vld [vmem:[#allocation2 + $0xf] sm:$0xff] }
  0x64   : > { %1102 = vmatprep.mubr.msk.f32.mxu1 %vm313_vm1, %v316_v16  ;;  %v491_v20 = vld [vmem:[#allocation2 + $0x9] sm:$0xff]  ;;  %1092 = vmatmul.mubr.msk.f32.vlgmr.msra.gmra.mxu0 %vm313_vm1, %v323_v17  ;;  %v492_v23 = vld [vmem:[#allocation2 + $0x11] sm:$0xff]  ;;  %p1336_p3 = pnand %p1335_p10, %p1329_p12 }
  0x65   : > { %1103 = vmatmul.mubr.msk.f32.vlgmr.msra.gmra.mxu1 %vm313_vm1, %v317_v18  ;;  %1106 = vmatpush3.msra.mxu0 %v497_v14  ;;  %v794_v9 = vld [vmem:[#allocation8 + $0x90] sm:$0xff]  ;;  %v793_v10 = vld [vmem:[#allocation8 + $0x88] sm:$0xff] }
  0x66   : > { %1113 = vmatprep.mubr.msk.f32.mxu0 %vm313_vm1, %v491_v20  ;;  %1107 = vmatprep.subr.mxu0 %v496_v19 }
  0x67   : > { %1108 = vmatpush3.msra.mxu0 %v496_v19  ;;  %1117 = vmatpush3.msra.mxu1 %v626_v24  ;;  %v1027_v19 = vld [vmem:[%s1674_s5] ss:$0 sm:$0xff] }
  0x68   : > { %1109 = vmatprep.subr.mxu0 %v495_v21  ;;  %1118 = vmatprep.subr.mxu1 %v625_v26 }
  0x69   : > { %1110 = vmatpush3.msra.mxu0 %v495_v21  ;;  %1119 = vmatpush3.msra.mxu1 %v625_v26 }
  0x6a   : > { %1111 = vmatprep.subr.mxu0 %v494_v22  ;;  %1120 = vmatprep.subr.mxu1 %v624_v30 }
  0x6b   : > { %1112 = vmatpush3.msra.mxu0 %v494_v22  ;;  %1121 = vmatpush3.msra.mxu1 %v624_v30 }
  0x6c   : > { %1114 = vmatmul.mubr.msk.f32.vlgmr.msra.gmra.mxu0 %vm313_vm1, %v492_v23  ;;  %1135 = vmatprep.subr.mxu0 %v615_v25 }
  0x6d   : > { %1136 = vmatpush3.msra.mxu0 %v615_v25  ;;  %1122 = vmatprep.subr.mxu1 %v623_v32 }
  0x6e   : > { %1137 = vmatprep.subr.mxu0 %v614_v29  ;;  %1123 = vmatpush3.msra.mxu1 %v623_v32 }
  0x6f   : > { %1138 = vmatpush3.msra.mxu0 %v614_v29  ;;  %1124 = vmatprep.subr.mxu1 %v622_v41 }
  0x70   : > { %1139 = vmatprep.subr.mxu0 %v613_v31  ;;  %1125 = vmatpush3.msra.mxu1 %v622_v41 }
  0x71   : > { %1140 = vmatpush3.msra.mxu0 %v613_v31  ;;  %1126 = vmatprep.subr.mxu1 %v621_v43 }
  0x72   : > { %1141 = vmatprep.subr.mxu0 %v612_v38  ;;  %1127 = vmatpush3.msra.mxu1 %v621_v43 }
  0x73   : > { %1142 = vmatpush3.msra.mxu0 %v612_v38  ;;  %1128 = vmatprep.subr.mxu1 %v620_v48 }
  0x74   : > { %1143 = vmatprep.subr.mxu0 %v611_v42  ;;  %1129 = vmatpush3.msra.mxu1 %v620_v48 }
  0x75   : > { %1144 = vmatpush3.msra.mxu0 %v611_v42  ;;  %1130 = vmatprep.subr.mxu1 %v619_v54 }
  0x76   : > { %1145 = vmatprep.subr.mxu0 %v610_v46  ;;  %1131 = vmatpush3.msra.mxu1 %v619_v54 }
  0x77   : > { %1146 = vmatpush3.msra.mxu0 %v610_v46  ;;  %1154 = vmatprep.subr.mxu1 %v799_v56 }
  0x78   : > { %1147 = vmatprep.subr.mxu0 %v609_v52 }
  0x79   : > { %1148 = vmatpush3.msra.mxu0 %v609_v52 }
  0x7a   : > { %1149 = vmatprep.subr.mxu0 %v608_v55 }
  0x7b   : > { %1150 = vmatpush3.msra.mxu0 %v608_v55 }
 0x124   : > { %v1093_v27 = vpop.f32.mrf.mxu0 }
 0x125   : > { %v1104_v28 = vpop.f32.mrf.mxu1 }
 0x126   : > { %v401_v33 = vpop.f32.mrf.mxu0  ;;  %v488_v35 = vadd.f32 %v1104_v28, %v1093_v27 }
 0x127   : > { %v482_v34 = vpop.f32.mrf.mxu1 }
 0x128   : > { %v483_v39 = vadd.f32 %v482_v34, %v401_v33 }
 0x12c   : > { %v1115_v36 = vpop.f32.mrf.mxu0 }
 0x12d   : > { %v580_v40 = vadd.f32 %v1115_v36, %v488_v35 }
 0x12e   : > { %v570_v45 = vpop.f32.mrf.mxu0 }
 0x12f   : > { %v579_v47 = vadd.f32 %v570_v45, %v483_v39  ;;  %v589_v50 = vadd.f32 %v1020_v44, %v580_v40 }
 0x131   : > { %v588_v51 = vadd.f32 %v1020_v44, %v579_v47  ;;  %v594_v57 = vmax.f32 %v589_v50, 0.0 }
 0x133   : > { %v593_v53 = vmax.f32 %v588_v51, 0.0  ;;  %v596_v59 = vsel %vm592_vm2, %v594_v57, %v589_v50 }
 0x135   : > { %v595_v58 = vsel %vm592_vm2, %v593_v53, %v588_v51 }
 0x136   : > { %597 = vrot.lane.b32.xlu0 %v595_v58, %s1402_s20 }
 0x13a   : > { %599 = vrot.lane.b32.xlu0 %v596_v59, %s1402_s20 }
 0x1a8   : > { %v598_v60 = vpop.permute.xlu0 %597 }
 0x1a9   : > { %v601_v61 = vadd.f32 %v598_v60, %v595_v58 }
 0x1ab   : > { %604 = vst.msk [vmem:[#allocation2 + $0x8] sm:$0xff] %vm603_vm3, %v601_v61 }
 0x1ac   : > { %v600_v62 = vpop.permute.xlu0 %599 }
 0x1ad   : > { %v602_v63 = vadd.f32 %v600_v62, %v596_v59 }
 0x1af   : > { %605 = vst.msk [vmem:[#allocation2 + $0x10] sm:$0xff] %vm603_vm3, %v602_v63 }
 0x1b2   : > { %v616_v0 = vld [vmem:[#allocation2 + $0x8] sm:$0xff] }
 0x1b3   : > { %v606_v1 = vld [vmem:[#allocation2 + $0x7] sm:$0xff]  ;;  %1132 = vmatprep.mubr.msk.f32.mxu1 %vm603_vm3, %v616_v0 }
 0x1b4   : > { %1151 = vmatprep.mubr.msk.f32.mxu0 %vm603_vm3, %v606_v1 }
 0x1b6   : > { %v617_v3 = vld [vmem:[#allocation2 + $0x10] sm:$0xff] }
 0x1b7   : > { %v607_v4 = vld [vmem:[#allocation2 + $0xf] sm:$0xff]  ;;  %1133 = vmatmul.mubr.msk.f32.vlgmr.msra.gmra.mxu1 %vm603_vm3, %v617_v3 }
 0x1b8   : > { %v789_v5 = vld [vmem:[#allocation2 + $0x9] sm:$0xff]  ;;  %1152 = vmatmul.mubr.msk.f32.vlgmr.msra.gmra.mxu0 %vm603_vm3, %v607_v4  ;;  %1155 = vmatpush3.msra.mxu1 %v799_v56  ;;  %v790_v12 = vld [vmem:[#allocation2 + $0x11] sm:$0xff] }
 0x1b9   : > { %1170 = vmatprep.mubr.msk.f32.mxu1 %vm603_vm3, %v789_v5  ;;  %1156 = vmatprep.subr.mxu1 %v798_v2 }
 0x1ba   : > { %1157 = vmatpush3.msra.mxu1 %v798_v2 }
 0x1bb   : > { %1158 = vmatprep.subr.mxu1 %v797_v6 }
 0x1bc   : > { %1159 = vmatpush3.msra.mxu1 %v797_v6 }
 0x1bd   : > { %1160 = vmatprep.subr.mxu1 %v796_v7 }
 0x1be   : > { %1161 = vmatpush3.msra.mxu1 %v796_v7 }
 0x1bf   : > { %1162 = vmatprep.subr.mxu1 %v795_v8 }
 0x1c0   : > { %1163 = vmatpush3.msra.mxu1 %v795_v8 }
 0x1c1   : > { %1164 = vmatprep.subr.mxu1 %v794_v9 }
 0x1c2   : > { %1165 = vmatpush3.msra.mxu1 %v794_v9 }
 0x1c3   : > { %1166 = vmatprep.subr.mxu1 %v793_v10 }
 0x1c4   : > { %1167 = vmatpush3.msra.mxu1 %v793_v10 }
 0x1c5   : > { %1168 = vmatprep.subr.mxu1 %v792_v11 }
 0x1c6   : > { %1169 = vmatpush3.msra.mxu1 %v792_v11 }
 0x1c7   : > { %1171 = vmatmul.mubr.msk.f32.vlgmr.msra.gmra.mxu1 %vm603_vm3, %v790_v12 }
 0x277   : > { %v1134_v13 = vpop.f32.mrf.mxu1 }
 0x278   : > { %v1153_v14 = vpop.f32.mrf.mxu0 }
 0x279   : > { %v699_v15 = vpop.f32.mrf.mxu1  ;;  %v786_v17 = vadd.f32 %v1153_v14, %v1134_v13 }
 0x27a   : > { %v780_v16 = vpop.f32.mrf.mxu0 }
 0x27b   : > { %v781_v20 = vadd.f32 %v780_v16, %v699_v15 }
 0x287   : > { %v1172_v18 = vpop.f32.mrf.mxu1 }
 0x288   : > { %v882_v21 = vadd.f32 %v1172_v18, %v786_v17 }
 0x289   : > { %v872_v22 = vpop.f32.mrf.mxu1 }
 0x28a   : > { %v891_v23 = vadd.f32 %v1027_v19, %v882_v21  ;;  %v881_v24 = vadd.f32 %v872_v22, %v781_v20 }
 0x28c   : > { %893 = vst.msk [vmem:[%s298_s10 + $0x8] sm:$0xff] %vm603_vm3, %v891_v23  ;;  %v890_v25 = vadd.f32 %v1027_v19, %v881_v24 }
 0x28e   : > { %892 = vst.msk [vmem:[%s298_s10] sm:$0xff] %vm603_vm3, %v890_v25 }
 0x28f   : > { %1339 = shalt.err (!%p1336_p3)
}
 0x290   : > { %s1340_s17 = scalar_lea.hbm %s1622_s18, 256  ;;  %s1344_s16 = scalar_lea.hbm %s1675_s6, 512 }
 0x291   : > { %p1341_p11 = scmp.ne.s32.totalorder %s1622_s18, %s1340_s17  ;;  %p1345_p4 = scmp.lt.s32.totalorder %s1622_s18, %s1675_s6 }
 0x292   : > { %p1346_p6 = scmp.lt.s32.totalorder %s1344_s16, %s1340_s17 }
 0x293   : > { %p1342_p9 = pnand %p1341_p11, %p1694_p2 }
 0x294   : > { %p1347_p8 = por %p1346_p6, %p1345_p4 }
 0x295   : > { %p1343_p1 = pneg %p1342_p9 }
 0x297   : > { %p1348_p5 = pnand %p1347_p8, %p1343_p1 }
 0x299   : > { %1351 = shalt.err (!%p1348_p5)
}
 0x29a   : > { %s1404_s11 = smov 128   ;;  %s1405_s9 = smov 8  }
 0x29b   : > { %1183 = dma.vmem_to_hbm [thread:$0]  (%p1694_p2), %s1624_s26, 256, %s1622_s18, %s895_s25, %s1404_s11, %s1404_s11, %s1405_s9  }
 0x29c PF: > { %s923_s13 = sand.u32 1, %s1382_s21   ;;  %p1695_p7 = scmp.ne.s32.totalorder %s1683_s28, 0 }
 0x29d   : > { %p1696_p12 = scmp.ge.s32.totalorder %s1394_s24, 2  ;;  %s924_s27 = scalar_lea.sflag [#allocation5], %s923_s13 }
 0x29f   : > { %p1197_p13 = pnand %p1696_p12, %p1695_p7 }
 0x2a1   : > { %p1198_p0 = pneg %p1197_p13 }
 0x2a3   : > { %1377 = dma.done.wait (%p1198_p0), %s924_s27, 256  }
 0x2a4   : > { %1379 = vsyncadd (%p1198_p0), %s924_s27, 4294967040  ;;  %p20_p10 = scmp.ge.s32.totalorder %s1519_s19, 4   ;;  %s1697_s21 = smov %s1386_s22 }
 0x2a5   : > { %s1698_s22 = smov %s1390_s23  ;;  %s1699_s23 = smov %s1535_s7 }
 0x2a6   : > { %s1700_s24 = smov %s1519_s19  ;;  %22 = sbr.rel (!%p20_p10) target bundleno = 6 (0x6), region = 101 }
 0x2ab   :  { %929 = vsyncpa [#allocation4], 1 }
 0x2ac   :  { %931 = vsyncpa [#allocation4 + $0x1], 1 }
 0x2ad   :  { %932 = vsyncpa [#allocation7], 1 }
 0x2ae   :  { %933 = vsyncpa [#allocation5], 1 }
 0x2af   :  { %935 = vsyncpa [#allocation5 + $0x1], 1 }

</bundles_post_ra>
